<compile_context>
chip_gen: v7x
topology: tpu7x:2x2x1
jax: 0.10.0
libtpu: 0.0.40
codegen_flags: <defaults>
</compile_context>

<pallas_src>
import functools

import jax
import jax.numpy as jnp
from jax.experimental import pallas as pl
from jax.experimental.pallas import tpu as pltpu


def _round_up(v, m):
    return ((v + m - 1) // m) * m


# --------------------------------------------------------------------------
# Fused kernel:  out_tile = act(x_tile @ W + eta) @ zeta
# --------------------------------------------------------------------------
def _fused_kernel(sigma_ref, x_ref, phi_ref, b_ref, zeta_ref, eta_ref,
                  out_ref, *, act, lamb, mxu_dtype):
    # ---- W = sigma * soft_threshold(phi @ b, lamb), rebuilt per batch tile.
    pb = jnp.dot(phi_ref[...], b_ref[...], preferred_element_type=jnp.float32)
    # Exact PyTorch semantics:
    #   F.threshold(pb, lamb, lamb) - F.threshold(-pb, lamb, lamb)
    t_pos = jnp.where(pb > lamb, pb, lamb)
    t_neg = jnp.where(-pb > lamb, -pb, lamb)
    w_hid = ((t_pos - t_neg) * sigma_ref[0]).astype(mxu_dtype)

    # ---- h = act(x @ W + eta); x tile cast in-kernel (no wrapper copy of x).
    x = x_ref[...].astype(mxu_dtype)
    h = jnp.dot(x, w_hid, preferred_element_type=jnp.float32)
    h = h + eta_ref[...]          # (1, n_hid_pad) broadcasts over batch rows
    if act == "relu":
        h = jnp.maximum(h, 0.0)
    elif act == "tanh":
        h = jnp.tanh(h)
    elif act == "sigmoid":
        h = jax.nn.sigmoid(h)
    else:
        raise ValueError("Invalid activation function %s" % act)

    # ---- out = h @ zeta, kept in f32 (tiny matmul; kernel is HBM-bound).
    out_ref[...] = jnp.dot(h, zeta_ref[...],
                           preferred_element_type=jnp.float32)


def bnnstgp_forward(x, phi, b, zeta, eta, sigma, *, lamb=1.0, act="relu",
                    bm=512, mxu_dtype=jnp.float32):
    """Pallas forward for BNNSTGP_one_layer. Returns (batch, output_dim) f32.

    mxu_dtype=jnp.bfloat16 halves MXU-input width on all generations
    (v5e included: only its VPU/EUP lack bf16, and activations stay f32).
    """
    batch, input_dim = x.shape
    n_knots, n_hid = b.shape
    output_dim = zeta.shape[1]
    assert phi.shape == (input_dim, n_knots)

    # Lane-dense padding of the hidden and output dims (zeros only).
    n_hid_pad = _round_up(max(n_hid, 1), 128)
    n_out_pad = _round_up(max(output_dim, 1), 128)

    phi32 = phi.astype(jnp.float32)
    b_p = jnp.zeros((n_knots, n_hid_pad), jnp.float32)
    b_p = b_p.at[:, :n_hid].set(b.astype(jnp.float32))
    zeta_p = jnp.zeros((n_hid_pad, n_out_pad), jnp.float32)
    zeta_p = zeta_p.at[:n_hid, :output_dim].set(zeta.astype(jnp.float32))
    eta_p = jnp.zeros((1, n_hid_pad), jnp.float32)
    eta_p = eta_p.at[0, :n_hid].set(eta.reshape(n_hid).astype(jnp.float32))
    sigma1d = jnp.asarray(sigma, jnp.float32).reshape(1)

    # Batch tile: as large as useful, multiple of 8 (sublane), clamped so tiny
    # batches do not pay for a mostly-masked tile.  x itself is NOT padded.
    bm_eff = max(8, min(_round_up(bm, 8), _round_up(batch, 8)))
    grid = (pl.cdiv(batch, bm_eff),)

    # Explicit VMEM budget: 2x double-buffered x tile + 2x output tile +
    # resident params + in-kernel pb/W/h temporaries, ~50% headroom.
    w_item = jnp.dtype(mxu_dtype).itemsize
    vmem_bytes = int(1.5 * (
        2 * bm_eff * input_dim * x.dtype.itemsize          # x tiles
        + 2 * bm_eff * n_out_pad * 4                       # output tiles
        + input_dim * _round_up(n_knots, 128) * 4          # phi (resident)
        + _round_up(n_knots, 8) * n_hid_pad * 4            # b   (resident)
        + n_hid_pad * n_out_pad * 4 + 128 * 4              # zeta, eta
        + input_dim * n_hid_pad * (4 + w_item)             # pb + W temps
        + bm_eff * n_hid_pad * 4                           # h temp
    )) + (4 << 20)
    vmem_bytes = max(32 << 20, min(vmem_bytes, 64 << 20))

    out_p = pl.pallas_call(
        functools.partial(_fused_kernel, act=act, lamb=float(lamb),
                          mxu_dtype=mxu_dtype),
        out_shape=jax.ShapeDtypeStruct((batch, n_out_pad), jnp.float32),
        grid_spec=pltpu.PrefetchScalarGridSpec(
            num_scalar_prefetch=1,          # sigma scalar -> SMEM
            grid=grid,
            in_specs=[
                # x: tiled over the batch dimension only; partial last block
                # is masked by Pallas (no wrapper pad).
                pl.BlockSpec((bm_eff, input_dim), lambda i, s: (i, 0)),
                # Constant parameters: whole arrays resident in VMEM.
                pl.BlockSpec(memory_space=pltpu.VMEM),   # phi
                pl.BlockSpec(memory_space=pltpu.VMEM),   # b   (lane-padded)
                pl.BlockSpec(memory_space=pltpu.VMEM),   # zeta (lane-padded)
                pl.BlockSpec(memory_space=pltpu.VMEM),   # eta  (1, n_hid_pad)
            ],
            out_specs=pl.BlockSpec((bm_eff, n_out_pad), lambda i, s: (i, 0)),
        ),
        compiler_params=pltpu.CompilerParams(
            dimension_semantics=("parallel",),
            vmem_limit_bytes=vmem_bytes),
    )(sigma1d, x, phi32, b_p, zeta_p, eta_p)

    return out_p[:, :output_dim]


def bnnstgp_forward_ref(x, phi, b, zeta, eta, sigma, *, lamb=1.0, act="relu"):
    """Pure-JAX reference mirroring the PyTorch forward exactly."""
    out = phi @ b
    out = jnp.where(out > lamb, out, lamb) - jnp.where(-out > lamb, -out, lamb)
    out = sigma * out
    out = x @ out + eta
    if act == "relu":
        out = jnp.maximum(out, 0.0)
    elif act == "tanh":
        out = jnp.tanh(out)
    else:
        out = jax.nn.sigmoid(out)
    return out @ zeta


if __name__ == "__main__":
    # Small, module-consistent shapes.  batch deliberately NOT a multiple of
    # the batch tile (exercises partial-block masking) and gives 2 grid steps.
    batch = 200
    input_dim = 96
    n_knots = 24
    n_hid = 64
    output_dim = 3
    w_dim = 5
    lamb = 1.0

    key = jax.random.PRNGKey(0)
    k_phi, k_b, k_zeta, k_x, k_w = jax.random.split(key, 5)

    # Deterministic parameter init matching the nn.Module __init__ shapes.
    phi = jax.random.normal(k_phi, (input_dim, n_knots), jnp.float32)
    b = jax.random.normal(k_b, (n_knots, n_hid), jnp.float32)        # N(0,1)
    zeta = jax.random.uniform(k_zeta, (n_hid, output_dim), jnp.float32,
                              minval=-1.0, maxval=1.0)               # U(-1,1)
    eta = jnp.zeros((n_hid,), jnp.float32)
    sigma = jnp.float32(1.0)
    alpha = jnp.zeros((w_dim, output_dim), jnp.float32)   # unused in forward

    x = jax.random.normal(k_x, (batch, input_dim), jnp.float32)
    w_in = jax.random.normal(k_w, (batch, w_dim), jnp.float32)  # unused in fwd

    # f32 MXU path, relu (exact).
    ref = bnnstgp_forward_ref(x, phi, b, zeta, eta, sigma, lamb=lamb,
                              act="relu")
    out = bnnstgp_forward(x, phi, b, zeta, eta, sigma, lamb=lamb, act="relu",
                          bm=128, mxu_dtype=jnp.float32)
    out = jax.block_until_ready(out)
    assert out.shape == (batch, output_dim)
    assert jnp.allclose(out, ref, atol=1e-3, rtol=1e-4), "f32 relu mismatch"

    # f32 path, sigmoid (verifies that the zero zeta padding never leaks the
    # 0.5-valued padded h columns into the output).
    ref_sig = bnnstgp_forward_ref(x, phi, b, zeta, eta, sigma, lamb=lamb,
                                  act="sigmoid")
    out_sig = bnnstgp_forward(x, phi, b, zeta, eta, sigma, lamb=lamb,
                              act="sigmoid", bm=128, mxu_dtype=jnp.float32)
    out_sig = jax.block_until_ready(out_sig)
    assert jnp.allclose(out_sig, ref_sig, atol=5e-3, rtol=1e-3), \
        "f32 sigmoid mismatch"

    # bf16 MXU-input path (first matmul only; second matmul stays f32).
    out_bf16 = bnnstgp_forward(x, phi, b, zeta, eta, sigma, lamb=lamb,
                               act="relu", bm=128, mxu_dtype=jnp.bfloat16)
    out_bf16 = jax.block_until_ready(out_bf16)
    tol = 0.05 * float(jnp.max(jnp.abs(ref)))
    assert jnp.allclose(out_bf16, ref, atol=tol), "bf16 mismatch vs ref"

    print("KERNEL_OK")
</pallas_src>

<mosaic_0001>
module attributes {stable_mosaic.version = 11 : i64} {
  func.func @_fused_kernel(%arg0: i32, %arg1: memref<1xf32, #tpu.memory_space<smem>>, %arg2: memref<128x96xf32, #tpu.memory_space<vmem>>, %arg3: memref<96x24xf32, #tpu.memory_space<vmem>>, %arg4: memref<24x128xf32, #tpu.memory_space<vmem>>, %arg5: memref<128x128xf32, #tpu.memory_space<vmem>>, %arg6: memref<1x128xf32, #tpu.memory_space<vmem>>, %arg7: memref<128x128xf32, #tpu.memory_space<vmem>>) attributes {dimension_semantics = [#tpu.dimension_semantics<parallel>], iteration_bounds = array<i64: 2>, scalar_prefetch = 1 : i64, scratch_operands = 0 : i64, tpu.core_type = #tpu.core_type<tc>, window_params = [{transform_indices = @transform_0, window_bounds = array<i64: 128, 96>}, {pipeline_mode = #tpu.pipeline_mode<synchronous>, transform_indices = @transform_1, window_bounds = array<i64: 96, 24>}, {pipeline_mode = #tpu.pipeline_mode<synchronous>, transform_indices = @transform_2, window_bounds = array<i64: 24, 128>}, {pipeline_mode = #tpu.pipeline_mode<synchronous>, transform_indices = @transform_3, window_bounds = array<i64: 128, 128>}, {pipeline_mode = #tpu.pipeline_mode<synchronous>, transform_indices = @transform_4, window_bounds = array<i64: 1, 128>}, {transform_indices = @transform_5, window_bounds = array<i64: 128, 128>}]} {
    %c0 = arith.constant 0 : index
    %c0_0 = arith.constant 0 : index
    %0 = vector.load %arg3[%c0, %c0_0] : memref<96x24xf32, #tpu.memory_space<vmem>>, vector<96x24xf32>
    %c0_1 = arith.constant 0 : index
    %c0_2 = arith.constant 0 : index
    %1 = vector.load %arg4[%c0_1, %c0_2] : memref<24x128xf32, #tpu.memory_space<vmem>>, vector<24x128xf32>
    %cst = arith.constant dense<0.000000e+00> : vector<96x128xf32>
    %2 = tpu.matmul %0, %1, %cst {dimension_numbers = #tpu.dot_dimension_numbers<[1], [0], [0], [1], [0, 0, 1, 1], [], []>} : vector<96x24xf32>, vector<24x128xf32>, vector<96x128xf32> -> vector<96x128xf32>
    %cst_3 = arith.constant 1.000000e+00 : f32
    %3 = vector.broadcast %cst_3 : f32 to vector<96x128xf32>
    %4 = arith.cmpf ogt, %2, %3 : vector<96x128xf32>
    %cst_4 = arith.constant 1.000000e+00 : f32
    %5 = vector.broadcast %cst_4 : f32 to vector<96x128xf32>
    %6 = arith.select %4, %2, %5 : vector<96x128xi1>, vector<96x128xf32>
    %cst_5 = arith.constant 0.000000e+00 : f32
    %7 = vector.broadcast %cst_5 : f32 to vector<96x128xf32>
    %8 = arith.subf %7, %2 : vector<96x128xf32>
    %cst_6 = arith.constant 1.000000e+00 : f32
    %9 = vector.broadcast %cst_6 : f32 to vector<96x128xf32>
    %10 = arith.cmpf ogt, %8, %9 : vector<96x128xf32>
    %cst_7 = arith.constant 0.000000e+00 : f32
    %11 = vector.broadcast %cst_7 : f32 to vector<96x128xf32>
    %12 = arith.subf %11, %2 : vector<96x128xf32>
    %cst_8 = arith.constant 1.000000e+00 : f32
    %13 = vector.broadcast %cst_8 : f32 to vector<96x128xf32>
    %14 = arith.select %10, %12, %13 : vector<96x128xi1>, vector<96x128xf32>
    %15 = arith.subf %6, %14 : vector<96x128xf32>
    %c0_9 = arith.constant 0 : index
    %16 = memref.load %arg1[%c0_9] : memref<1xf32, #tpu.memory_space<smem>>
    %17 = vector.broadcast %16 : f32 to vector<96x128xf32>
    %18 = arith.mulf %15, %17 : vector<96x128xf32>
    %c0_10 = arith.constant 0 : index
    %c0_11 = arith.constant 0 : index
    %19 = vector.load %arg2[%c0_10, %c0_11] : memref<128x96xf32, #tpu.memory_space<vmem>>, vector<128x96xf32>
    %cst_12 = arith.constant dense<0.000000e+00> : vector<128x128xf32>
    %20 = tpu.matmul %19, %18, %cst_12 {dimension_numbers = #tpu.dot_dimension_numbers<[1], [0], [0], [1], [0, 0, 1, 1], [], []>} : vector<128x96xf32>, vector<96x128xf32>, vector<128x128xf32> -> vector<128x128xf32>
    %c0_13 = arith.constant 0 : index
    %c0_14 = arith.constant 0 : index
    %21 = vector.load %arg6[%c0_13, %c0_14] : memref<1x128xf32, #tpu.memory_space<vmem>>, vector<1x128xf32>
    %22 = vector.broadcast %21 : vector<1x128xf32> to vector<128x128xf32>
    %23 = arith.addf %20, %22 : vector<128x128xf32>
    %cst_15 = arith.constant 0.000000e+00 : f32
    %24 = vector.broadcast %cst_15 : f32 to vector<128x128xf32>
    %25 = arith.maximumf %23, %24 : vector<128x128xf32>
    %c0_16 = arith.constant 0 : index
    %c0_17 = arith.constant 0 : index
    %26 = vector.load %arg5[%c0_16, %c0_17] : memref<128x128xf32, #tpu.memory_space<vmem>>, vector<128x128xf32>
    %cst_18 = arith.constant dense<0.000000e+00> : vector<128x128xf32>
    %27 = tpu.matmul %25, %26, %cst_18 {dimension_numbers = #tpu.dot_dimension_numbers<[1], [0], [0], [1], [0, 0, 1, 1], [], []>} : vector<128x128xf32>, vector<128x128xf32>, vector<128x128xf32> -> vector<128x128xf32>
    %c0_19 = arith.constant 0 : index
    %c0_20 = arith.constant 0 : index
    %28 = vector.load %arg7[%c0_19, %c0_20] : memref<128x128xf32, #tpu.memory_space<vmem>>, vector<128x128xf32>
    tpu.vector_store %arg7[%c0_19, %c0_20], %27 {strides = array<i32>} : memref<128x128xf32, #tpu.memory_space<vmem>>, vector<128x128xf32>,
    return
  }
  func.func @transform_0(%arg0: i32, %arg1: memref<1xf32, #tpu.memory_space<smem>>) -> (i32, i32) {
    %c0_i32 = arith.constant 0 : i32
    %c0_i32_0 = arith.constant 0 : i32
    return %arg0, %c0_i32 : i32, i32
  }
  func.func @transform_1(%arg0: i32, %arg1: memref<1xf32, #tpu.memory_space<smem>>) -> (i32, i32) {
    %c0_i32 = arith.constant 0 : i32
    %c0_i32_0 = arith.constant 0 : i32
    %c0_i32_1 = arith.constant 0 : i32
    return %c0_i32, %c0_i32_0 : i32, i32
  }
  func.func @transform_2(%arg0: i32, %arg1: memref<1xf32, #tpu.memory_space<smem>>) -> (i32, i32) {
    %c0_i32 = arith.constant 0 : i32
    %c0_i32_0 = arith.constant 0 : i32
    %c0_i32_1 = arith.constant 0 : i32
    return %c0_i32, %c0_i32_0 : i32, i32
  }
  func.func @transform_3(%arg0: i32, %arg1: memref<1xf32, #tpu.memory_space<smem>>) -> (i32, i32) {
    %c0_i32 = arith.constant 0 : i32
    %c0_i32_0 = arith.constant 0 : i32
    %c0_i32_1 = arith.constant 0 : i32
    return %c0_i32, %c0_i32_0 : i32, i32
  }
  func.func @transform_4(%arg0: i32, %arg1: memref<1xf32, #tpu.memory_space<smem>>) -> (i32, i32) {
    %c0_i32 = arith.constant 0 : i32
    %c0_i32_0 = arith.constant 0 : i32
    %c0_i32_1 = arith.constant 0 : i32
    return %c0_i32, %c0_i32_0 : i32, i32
  }
  func.func @transform_5(%arg0: i32, %arg1: memref<1xf32, #tpu.memory_space<smem>>) -> (i32, i32) {
    %c0_i32 = arith.constant 0 : i32
    %c0_i32_0 = arith.constant 0 : i32
    return %arg0, %c0_i32 : i32, i32
  }
}

</mosaic_0001>

<bundles_post_ra>
// kernel: tpu_custom_call.1
= control target key start
LH: loop header
LB: loop body
LE: loop exit
PB: predicated region body
PF: predicated region fallthrough
CT: control target
= control target key end

     0   :  { %s1757_s0 = inlined_call_operand.<no memory space> [shape: f32[1], index: 0, kind: input, shape index: {}]   ;;  %s1758_s1 = inlined_call_operand.vmem [shape: f32[200,96], index: 1, kind: input, shape index: {}]   ;;  %s1759_s2 = inlined_call_operand.vmem [shape: f32[96,24], index: 2, kind: input, shape index: {}]   ;;  %s1760_s3 = inlined_call_operand.vmem [shape: f32[24,128], index: 3, kind: input, shape index: {}]   ;;  %s1761_s4 = inlined_call_operand.vmem [shape: f32[128,128], index: 4, kind: input, shape index: {}]   ;;  %s1762_s5 = inlined_call_operand.vmem [shape: f32[1,128], index: 5, kind: input, shape index: {}]   ;;  %s1763_s6 = inlined_call_operand.hbm [shape: f32[200,128], index: 6, kind: output, shape index: {}]  }
   0x1   :  { %11 = sst [smem:[#allocation3]] %s1757_s0 }
   0x2   :  { %12 = vsyncpa [#allocation5], 0 }
   0x3   :  { %14 = vsyncpa [#allocation5 + $0x1], 0  ;;  %s1461_s23 = smov 0   ;;  %s1463_s24 = smov 0  }
   0x4   :  { %s1465_s25 = smov 0   ;;  %s1467_s26 = smov 0  }
   0x5 LB: > { %s1482_s0 = sadd.s32 4294967295, %s1418_s26   ;;  %s1007_s27 = sadd.s32 4294967294, %s1418_s26   ;;  %s1418_s26 = sphi %s1467_s26, %s1769_s26   ;;  %s1414_s25 = sphi %s1465_s25, %s1768_s25   ;;  %s1410_s24 = sphi %s1463_s24, %s1767_s24   ;;  %s1406_s23 = sphi %s1461_s23, %s1766_s23  }
   0x6   : > { %s1486_s28 = sadd.s32 1, %s1418_s26   ;;  %s137_s29 = sadd.s32 1, %s1414_s25 }
   0x7   : > { %s134_s30 = ssub.s32 %s1418_s26, %s1486_s28  ;;  %p147_p0 = scmp.ne.s32.totalorder %s1414_s25, %s1410_s24 }
   0x8   : > { %p135_p1 = scmp.eq.s32.totalorder %s134_s30, 0  ;;  %p148_p2 = scmp.eq.s32.totalorder %s1482_s0, 1 }
   0x9   : > { %p153_p3 = scmp.ne.s32.totalorder %s1410_s24, %s1406_s23  ;;  %p154_p4 = scmp.eq.s32.totalorder %s1007_s27, 1 }
   0xa   : > { %s1497_s7 = scalar_select %p135_p1, %s1414_s25, %s137_s29  }
   0xb   : > { %p1499_p5 = por %p148_p2, %p147_p0  ;;  %p1503_p6 = por %p154_p4, %p153_p3 }
   0xc   : > { %p1010_p7 = scmp.ge.s32.totalorder %s1418_s26, 1  ;;  %p201_p8 = scmp.lt.s32.totalorder %s1418_s26, 3 }
   0xe   : > { %p202_p9 = pnand %p1010_p7, %p201_p8 }
   0xf   : > { %v264_v0 = vld [vmem:[%s1760_s3] sm:$0xff] (!%p202_p9)  ;;  %v265_v1 = vld [vmem:[%s1760_s3 + $0x8] sm:$0xff] (!%p202_p9)  ;;  %vm267_vm0 = vcmask (!%p202_p9), 195584   ;;  %v266_v4 = vld [vmem:[%s1760_s3 + $0x10] sm:$0xff] (!%p202_p9)  ;;  %s1567_s29 = sshll.u32 (!%p202_p9), %s1482_s0, 4  ;;  %vm538_vm1 = vcmask (!%p202_p9), 785408  }
  0x10   : > { %205 = sbr.rel (%p202_p9) target bundleno = 760 (0x2f8), region = 40  ;;  %v1256_v2 = vpack.c.bf16 (!%p202_p9), %v265_v1, %v264_v0  ;;  %v252_v3 = vld [vmem:[%s1759_s2] sm:$0xff] (!%p202_p9)  ;;  %v253_v5 = vld [vmem:[%s1759_s2 + $0x8] sm:$0xff] (!%p202_p9)  ;;  %v254_v6 = vld [vmem:[%s1759_s2 + $0x10] sm:$0xff] (!%p202_p9)  ;;  %p238_p10 = scmp.lt.s32.totalorder (!%p202_p9), %s1567_s29, 24 }
  0x11   : > { %1134 = vmatprep.mubr.msk.f32.mxu1 (!%p202_p9), %vm267_vm0, %v252_v3  ;;  %v255_v7 = vld [vmem:[%s1759_s2 + $0x18] sm:$0xff] (!%p202_p9)  ;;  %v256_v8 = vld [vmem:[%s1759_s2 + $0x20] sm:$0xff] (!%p202_p9)  ;;  %v257_v9 = vld [vmem:[%s1759_s2 + $0x28] sm:$0xff] (!%p202_p9)  ;;  %s501_s14 = sld [smem:[#allocation3]] (!%p202_p9) }
  0x12   : > { %1257 = vmatprep.subr.bf16.mxu1 (!%p202_p9), %v1256_v2  ;;  %v258_v10 = vld [vmem:[%s1759_s2 + $0x30] sm:$0xff] (!%p202_p9)  ;;  %v259_v11 = vld [vmem:[%s1759_s2 + $0x38] sm:$0xff] (!%p202_p9)  ;;  %v260_v12 = vld [vmem:[%s1759_s2 + $0x40] sm:$0xff] (!%p202_p9) }
  0x13   : > { %1259 = vmatpush3.bf16.msra.mxu1 (!%p202_p9), %v1256_v2  ;;  %v261_v13 = vld [vmem:[%s1759_s2 + $0x48] sm:$0xff] (!%p202_p9)  ;;  %v262_v14 = vld [vmem:[%s1759_s2 + $0x50] sm:$0xff] (!%p202_p9)  ;;  %v263_v15 = vld [vmem:[%s1759_s2 + $0x58] sm:$0xff] (!%p202_p9) }
  0x14   : > { %1132 = vmatprep.subr.mxu1 (!%p202_p9), %v266_v4  ;;  %v748_v17 = vld [vmem:[%s1761_s4] sm:$0xff] (!%p202_p9)  ;;  %v749_v18 = vld [vmem:[%s1761_s4 + $0x8] sm:$0xff] (!%p202_p9)  ;;  %v750_v19 = vld [vmem:[%s1761_s4 + $0x10] sm:$0xff] (!%p202_p9) }
  0x15   : > { %v1284_v20 = vpack.c.bf16 (!%p202_p9), %v749_v18, %v748_v17  ;;  %v751_v21 = vld [vmem:[%s1761_s4 + $0x18] sm:$0xff] (!%p202_p9)  ;;  %v752_v23 = vld [vmem:[%s1761_s4 + $0x20] sm:$0xff] (!%p202_p9)  ;;  %v753_v24 = vld [vmem:[%s1761_s4 + $0x28] sm:$0xff] (!%p202_p9) }
  0x16   : > { %v1288_v22 = vpack.c.bf16 (!%p202_p9), %v751_v21, %v750_v19  ;;  %v1292_v25 = vpack.c.bf16 (!%p202_p9), %v753_v24, %v752_v23  ;;  %v754_v26 = vld [vmem:[%s1761_s4 + $0x30] sm:$0xff] (!%p202_p9)  ;;  %v755_v27 = vld [vmem:[%s1761_s4 + $0x38] sm:$0xff] (!%p202_p9)  ;;  %v756_v29 = vld [vmem:[%s1761_s4 + $0x40] sm:$0xff] (!%p202_p9) }
  0x17   : > { %1133 = vmatpush3.msra.mxu1 %v266_v4  ;;  %s239_s30 = scalar_select %p238_p10, %s1567_s29, 24  ;;  %1285 = vmatprep.subr.bf16.mxu0 %v1284_v20  ;;  %v1296_v28 = vpack.c.bf16 %v755_v27, %v754_v26  ;;  %v757_v30 = vld [vmem:[%s1761_s4 + $0x48] sm:$0xff]  ;;  %v758_v32 = vld [vmem:[%s1761_s4 + $0x50] sm:$0xff]  ;;  %v759_v33 = vld [vmem:[%s1761_s4 + $0x58] sm:$0xff]  ;;  %v1620_v42 = vstv %s501_s14 }
  0x18   : > { %1135 = vmatmul.mubr.msk.f32.vlgmr.msra.gmra.mrb[0].mxu1 %vm267_vm0, %v253_v5  ;;  %1287 = vmatpush3.bf16.msra.mxu0 %v1284_v20  ;;  %v1300_v31 = vpack.c.bf16 %v757_v30, %v756_v29  ;;  %v1304_v34 = vpack.c.bf16 %v759_v33, %v758_v32  ;;  %v760_v35 = vld [vmem:[%s1761_s4 + $0x60] sm:$0xff]  ;;  %v761_v36 = vld [vmem:[%s1761_s4 + $0x68] sm:$0xff] }
  0x19   : > { %1137 = vmatprep.mubr.msk.f32.mxu1 %vm267_vm0, %v254_v6  ;;  %s1013_s10 = sshll.u32 %s239_s30, 3  ;;  %1289 = vmatprep.subr.bf16.mxu0 %v1288_v22  ;;  %v1308_v37 = vpack.c.bf16 %v761_v36, %v760_v35  ;;  %s934_s30 = ssub.s32 (%p1499_p5), 25, %s1567_s29 }
  0x1a   : > { %s1574_s13 = scalar_lea.vmem %s1758_s1, %s1013_s10  ;;  %p935_p11 = scmp.lt.s32.totalorder (%p1499_p5), %s934_s30, 16 }
  0x1b   : > { %v515_v16 = vld [vmem:[%s1574_s13] sm:$0xff] }
  0x1c   : > { %1138 = vmatmul.mubr.msk.f32.gmra.mrb[2].mxu1 %vm267_vm0, %v255_v7  ;;  %1291 = vmatpush3.bf16.msra.mxu0 %v1288_v22 }
  0x1d   : > { %1140 = vmatprep.mubr.msk.f32.mxu1 %vm267_vm0, %v256_v8  ;;  %1293 = vmatprep.subr.bf16.mxu0 %v1292_v25 }
  0x20   : > { %1141 = vmatmul.mubr.msk.f32.gmra.mrb[4].mxu1 %vm267_vm0, %v257_v9  ;;  %1295 = vmatpush3.bf16.msra.mxu0 %v1292_v25 }
  0x21   : > { %1143 = vmatprep.mubr.msk.f32.mxu1 %vm267_vm0, %v258_v10  ;;  %1297 = vmatprep.subr.bf16.mxu0 %v1296_v28 }
  0x24   : > { %1144 = vmatmul.mubr.msk.f32.gmra.mrb[6].mxu1 %vm267_vm0, %v259_v11  ;;  %1299 = vmatpush3.bf16.msra.mxu0 %v1296_v28 }
  0x25   : > { %1146 = vmatprep.mubr.msk.f32.mxu1 %vm267_vm0, %v260_v12  ;;  %1301 = vmatprep.subr.bf16.mxu0 %v1300_v31 }
  0x28   : > { %1147 = vmatmul.mubr.msk.f32.gmra.mrb[8].mxu1 %vm267_vm0, %v261_v13  ;;  %1303 = vmatpush3.bf16.msra.mxu0 %v1300_v31 }
  0x29   : > { %1149 = vmatprep.mubr.msk.f32.mxu1 %vm267_vm0, %v262_v14  ;;  %1305 = vmatprep.subr.bf16.mxu0 %v1304_v34 }
  0x2c   : > { %1150 = vmatmul.mubr.msk.f32.gmra.mrb[10].mxu1 %vm267_vm0, %v263_v15  ;;  %1307 = vmatpush3.bf16.msra.mxu0 %v1304_v34 }
  0x2d   : > { %1176 = vmatprep.mubr.msk.f32.mxu1 %vm538_vm1, %v515_v16  ;;  %1309 = vmatprep.subr.bf16.mxu0 %v1308_v37 }
  0x30   : > { %1311 = vmatpush3.bf16.msra.mxu0 %v1308_v37 }
  0xeb   : > { %v1136_v38 = vpop.f32.mrb[0].mxu1 }
  0xec   : > { %vm430_vm2 = vcmp.gt.f32.partialorder %v1136_v38, 1.0  ;;  %v454_v39 = vsub.f32 0.0, %v1136_v38  ;;  %v370_v40 = vpop.f32.mrb[1].mxu1 }
  0xed   : > { %vm429_vm3 = vcmp.gt.f32.partialorder %v370_v40, 1.0  ;;  %v453_v41 = vsub.f32 0.0, %v370_v40  ;;  %v442_v43 = vsel %vm430_vm2, %v1136_v38, 1.0 }
  0xee   : > { %vm466_vm4 = vcmp.gt.f32.partialorder %v454_v39, 1.0  ;;  %v441_v45 = vsel %vm429_vm3, %v370_v40, 1.0 }
  0xef   : > { %v478_v44 = vsel %vm466_vm4, %v454_v39, 1.0  ;;  %vm465_vm5 = vcmp.gt.f32.partialorder %v453_v41, 1.0  ;;  %v1139_v46 = vpop.f32.mrb[2].mxu1 }
  0xf0   : > { %v490_v47 = vsub.f32 %v442_v43, %v478_v44  ;;  %v477_v48 = vsel %vm465_vm5, %v453_v41, 1.0  ;;  %vm432_vm6 = vcmp.gt.f32.partialorder %v1139_v46, 1.0  ;;  %v456_v49 = vsub.f32 0.0, %v1139_v46  ;;  %v380_v50 = vpop.f32.mrb[3].mxu1 }
  0xf1   : > { %v489_v51 = vsub.f32 %v441_v45, %v477_v48  ;;  %vm431_vm7 = vcmp.gt.f32.partialorder %v380_v50, 1.0  ;;  %v455_v52 = vsub.f32 0.0, %v380_v50  ;;  %v444_v53 = vsel %vm432_vm6, %v1139_v46, 1.0 }
  0xf2   : > { %vm468_vm8 = vcmp.gt.f32.partialorder %v456_v49, 1.0  ;;  %v504_v54 = vmul.f32 %v1620_v42, %v490_v47  ;;  %v443_v56 = vsel %vm431_vm7, %v380_v50, 1.0 }
  0xf3   : > { %v480_v55 = vsel %vm468_vm8, %v456_v49, 1.0  ;;  %vm467_vm9 = vcmp.gt.f32.partialorder %v455_v52, 1.0  ;;  %v1142_v57 = vpop.f32.mrb[4].mxu1  ;;  %v503_v58 = vmul.f32 %v1620_v42, %v489_v51 }
  0xf4   : > { %v492_v59 = vsub.f32 %v444_v53, %v480_v55  ;;  %v479_v60 = vsel %vm467_vm9, %v455_v52, 1.0  ;;  %vm434_vm10 = vcmp.gt.f32.partialorder %v1142_v57, 1.0  ;;  %v458_v61 = vsub.f32 0.0, %v1142_v57  ;;  %v390_v62 = vpop.f32.mrb[5].mxu1  ;;  %v517_v55 = vld [vmem:[%s1574_s13 + $0x10] sm:$0xff] }
  0xf5   : > { %v491_v63 = vsub.f32 %v443_v56, %v479_v60  ;;  %vm433_vm11 = vcmp.gt.f32.partialorder %v390_v62, 1.0  ;;  %v457_v0 = vsub.f32 0.0, %v390_v62  ;;  %v446_v1 = vsel %vm434_vm10, %v1142_v57, 1.0  ;;  %v518_v56 = vld [vmem:[%s1574_s13 + $0x18] sm:$0xff]  ;;  %v519_v57 = vld [vmem:[%s1574_s13 + $0x20] sm:$0xff] }
  0xf6   : > { %vm470_vm12 = vcmp.gt.f32.partialorder %v458_v61, 1.0  ;;  %v1260_v2 = vpack.c.bf16 %v504_v54, %v503_v58  ;;  %v506_v3 = vmul.f32 %v1620_v42, %v492_v59  ;;  %v445_v5 = vsel %vm433_vm11, %v390_v62, 1.0  ;;  %v516_v54 = vld [vmem:[%s1574_s13 + $0x8] sm:$0xff]  ;;  %v521_v58 = vld [vmem:[%s1574_s13 + $0x30] sm:$0xff]  ;;  %v522_v59 = vld [vmem:[%s1574_s13 + $0x38] sm:$0xff] }
  0xf7   : > { %v482_v4 = vsel %vm470_vm12, %v458_v61, 1.0  ;;  %vm469_vm13 = vcmp.gt.f32.partialorder %v457_v0, 1.0  ;;  %v1145_v6 = vpop.f32.mrb[6].mxu1  ;;  %v505_v7 = vmul.f32 %v1620_v42, %v491_v63  ;;  %v523_v60 = vld [vmem:[%s1574_s13 + $0x40] sm:$0xff]  ;;  %v524_v61 = vld [vmem:[%s1574_s13 + $0x48] sm:$0xff]  ;;  %v525_v62 = vld [vmem:[%s1574_s13 + $0x50] sm:$0xff] }
  0xf8   : > { %v494_v8 = vsub.f32 %v446_v1, %v482_v4  ;;  %v481_v9 = vsel %vm469_vm13, %v457_v0, 1.0  ;;  %vm436_vm14 = vcmp.gt.f32.partialorder %v1145_v6, 1.0  ;;  %v460_v10 = vsub.f32 0.0, %v1145_v6  ;;  %1261 = vmatprep.subr.bf16.mxu1 %v1260_v2  ;;  %v400_v11 = vpop.f32.mrb[7].mxu1  ;;  %v526_v63 = vld [vmem:[%s1574_s13 + $0x58] sm:$0xff]  ;;  %v527_v0 = vld [vmem:[%s1574_s13 + $0x60] sm:$0xff] }
  0xf9   : > { %v493_v12 = vsub.f32 %v445_v5, %v481_v9  ;;  %vm435_vm15 = vcmp.gt.f32.partialorder %v400_v11, 1.0  ;;  %v459_v13 = vsub.f32 0.0, %v400_v11  ;;  %1263 = vmatpush3.bf16.msra.mxu1 %v1260_v2  ;;  %v448_v14 = vsel %vm436_vm14, %v1145_v6, 1.0  ;;  %v528_v1 = vld [vmem:[%s1574_s13 + $0x68] sm:$0xff]  ;;  %v529_v2 = vld [vmem:[%s1574_s13 + $0x70] sm:$0xff]  ;;  %v763_v5 = vld [vmem:[%s1761_s4 + $0x78] sm:$0xff] }
  0xfa   : > { %vm472_vm0 = vcmp.gt.f32.partialorder %v460_v10, 1.0  ;;  %v1264_v15 = vpack.c.bf16 %v506_v3, %v505_v7  ;;  %v508_v16 = vmul.f32 %v1620_v42, %v494_v8  ;;  %v447_v18 = vsel %vm435_vm15, %v400_v11, 1.0  ;;  %v530_v3 = vld [vmem:[%s1574_s13 + $0x78] sm:$0xff]  ;;  %v762_v4 = vld [vmem:[%s1761_s4 + $0x70] sm:$0xff]  ;;  %v1026_v7 = vld [vmem:[%s1762_s5] ss:$0 sm:$0xff] }
  0xfb   : > { %v484_v17 = vsel %vm472_vm0, %v460_v10, 1.0  ;;  %vm471_vm2 = vcmp.gt.f32.partialorder %v459_v13, 1.0  ;;  %v1148_v19 = vpop.f32.mrb[8].mxu1  ;;  %v507_v20 = vmul.f32 %v1620_v42, %v493_v12  ;;  %v1312_v6 = vpack.c.bf16 %v763_v5, %v762_v4 }
  0xfc   : > { %v496_v21 = vsub.f32 %v448_v14, %v484_v17  ;;  %v483_v22 = vsel %vm471_vm2, %v459_v13, 1.0  ;;  %vm438_vm3 = vcmp.gt.f32.partialorder %v1148_v19, 1.0  ;;  %v462_v23 = vsub.f32 0.0, %v1148_v19  ;;  %1265 = vmatprep.subr.bf16.mxu1 %v1264_v15  ;;  %v410_v24 = vpop.f32.mrb[9].mxu1 }
  0xfd   : > { %v495_v25 = vsub.f32 %v447_v18, %v483_v22  ;;  %vm437_vm4 = vcmp.gt.f32.partialorder %v410_v24, 1.0  ;;  %v461_v26 = vsub.f32 0.0, %v410_v24  ;;  %1267 = vmatpush3.bf16.msra.mxu1 %v1264_v15  ;;  %v450_v27 = vsel %vm438_vm3, %v1148_v19, 1.0  ;;  %1313 = vmatprep.subr.bf16.mxu0 %v1312_v6 }
  0xfe   : > { %vm474_vm5 = vcmp.gt.f32.partialorder %v462_v23, 1.0  ;;  %v1268_v28 = vpack.c.bf16 %v508_v16, %v507_v20  ;;  %v510_v29 = vmul.f32 %v1620_v42, %v496_v21  ;;  %v449_v31 = vsel %vm437_vm4, %v410_v24, 1.0  ;;  %1315 = vmatpush3.bf16.msra.mxu0 %v1312_v6 }
  0xff   : > { %v486_v30 = vsel %vm474_vm5, %v462_v23, 1.0  ;;  %vm473_vm6 = vcmp.gt.f32.partialorder %v461_v26, 1.0  ;;  %v1151_v32 = vpop.f32.mrb[10].mxu1  ;;  %v509_v33 = vmul.f32 %v1620_v42, %v495_v25 }
 0x100   : > { %v498_v34 = vsub.f32 %v450_v27, %v486_v30  ;;  %v485_v35 = vsel %vm473_vm6, %v461_v26, 1.0  ;;  %vm440_vm7 = vcmp.gt.f32.partialorder %v1151_v32, 1.0  ;;  %v464_v36 = vsub.f32 0.0, %v1151_v32  ;;  %1269 = vmatprep.subr.bf16.mxu1 %v1268_v28  ;;  %v420_v37 = vpop.f32.mrb[11].mxu1 }
 0x101   : > { %v497_v38 = vsub.f32 %v449_v31, %v485_v35  ;;  %vm439_vm8 = vcmp.gt.f32.partialorder %v420_v37, 1.0  ;;  %v463_v39 = vsub.f32 0.0, %v420_v37  ;;  %1271 = vmatpush3.bf16.msra.mxu1 %v1268_v28  ;;  %v1272_v40 = vpack.c.bf16 %v510_v29, %v509_v33 }
 0x102   : > { %vm476_vm9 = vcmp.gt.f32.partialorder %v464_v36, 1.0  ;;  %v512_v41 = vmul.f32 %v1620_v42, %v498_v34  ;;  %v452_v43 = vsel %vm440_vm7, %v1151_v32, 1.0  ;;  %v451_v47 = vsel %vm439_vm8, %v420_v37, 1.0 }
 0x103   : > { %v488_v44 = vsel %vm476_vm9, %v464_v36, 1.0  ;;  %vm475_vm10 = vcmp.gt.f32.partialorder %v463_v39, 1.0  ;;  %v511_v45 = vmul.f32 %v1620_v42, %v497_v38  ;;  %1273 = vmatprep.subr.bf16.mxu1 %v1272_v40 }
 0x104   : > { %v500_v46 = vsub.f32 %v452_v43, %v488_v44  ;;  %v487_v48 = vsel %vm475_vm10, %v463_v39, 1.0 }
 0x105   : > { %v499_v49 = vsub.f32 %v451_v47, %v487_v48  ;;  %1275 = vmatpush3.bf16.msra.mxu1 %v1272_v40  ;;  %v1276_v50 = vpack.c.bf16 %v512_v41, %v511_v45 }
 0x106   : > { %v514_v51 = vmul.f32 %v1620_v42, %v500_v46 }
 0x107   : > { %1277 = vmatprep.subr.bf16.mxu1 %v1276_v50  ;;  %v513_v52 = vmul.f32 %v1620_v42, %v499_v49  ;;  %v520_v42 = vld [vmem:[%s1574_s13 + $0x28] sm:$0xff]  ;;  %s230_s13 = sand.u32 1, %s1410_s24  }
 0x108   : > { %s1011_s21 = sshll.u32 %s230_s13, 7  ;;  %s1696_s27 = scalar_lea.sflag [#allocation5], %s230_s13 }
 0x109   : > { %1279 = vmatpush3.bf16.msra.mxu1 %v1276_v50  ;;  %v1280_v53 = vpack.c.bf16 %v514_v51, %v513_v52  ;;  %s1676_s22 = scalar_lea.vmem [#allocation4], %s1011_s21 }
 0x10b   : > { %1281 = vmatprep.subr.bf16.mxu1 %v1280_v53 }
 0x10d   : > { %1283 = vmatpush3.bf16.msra.mxu1 %v1280_v53 }
 0x110   : > { %1177 = vmatmul.mubr.msk.f32.vlgmr.msra.gmra.mrb[12].mxu1 %vm538_vm1, %v516_v54 }
 0x111   : > { %1179 = vmatprep.mubr.msk.f32.mxu1 %vm538_vm1, %v517_v55 }
 0x114   : > { %1180 = vmatmul.mubr.msk.f32.gmra.mrb[14].mxu1 %vm538_vm1, %v518_v56 }
 0x115   : > { %1182 = vmatprep.mubr.msk.f32.mxu1 %vm538_vm1, %v519_v57 }
 0x118   : > { %1183 = vmatmul.mubr.msk.f32.gmra.mrb[16].mxu1 %vm538_vm1, %v520_v42 }
 0x119   : > { %1185 = vmatprep.mubr.msk.f32.mxu1 %vm538_vm1, %v521_v58 }
 0x11c   : > { %1186 = vmatmul.mubr.msk.f32.gmra.mrb[18].mxu1 %vm538_vm1, %v522_v59 }
 0x11d   : > { %1188 = vmatprep.mubr.msk.f32.mxu1 %vm538_vm1, %v523_v60 }
 0x120   : > { %1189 = vmatmul.mubr.msk.f32.gmra.mrb[20].mxu1 %vm538_vm1, %v524_v61 }
 0x121   : > { %1191 = vmatprep.mubr.msk.f32.mxu1 %vm538_vm1, %v525_v62 }
 0x124   : > { %1192 = vmatmul.mubr.msk.f32.gmra.mrb[22].mxu1 %vm538_vm1, %v526_v63 }
 0x125   : > { %1194 = vmatprep.mubr.msk.f32.mxu1 %vm538_vm1, %v527_v0 }
 0x128   : > { %1195 = vmatmul.mubr.msk.f32.gmra.mrb[24].mxu1 %vm538_vm1, %v528_v1 }
 0x129   : > { %1197 = vmatprep.mubr.msk.f32.mxu1 %vm538_vm1, %v529_v2 }
 0x12c   : > { %1198 = vmatmul.mubr.msk.f32.gmra.mrb[26].mxu1 %vm538_vm1, %v530_v3 }
 0x1e3   : > { %v1178_v8 = vpop.f32.mrb[12].mxu1 }
 0x1e4   : > { %v659_v9 = vadd.f32 %v1178_v8, %v1026_v7  ;;  %v653_v10 = vpop.f32.mrb[13].mxu1 }
 0x1e5   : > { %v654_v11 = vadd.f32 %v1026_v7, %v653_v10 }
 0x1e6   : > { %v733_v14 = vmax.f32 %v659_v9, 0.0 }
 0x1e7   : > { %v1181_v12 = vpop.f32.mrb[14].mxu1  ;;  %v732_v13 = vmax.f32 %v654_v11, 0.0 }
 0x1e8   : > { %v669_v15 = vadd.f32 %v1181_v12, %v1026_v7  ;;  %v663_v16 = vpop.f32.mrb[15].mxu1 }
 0x1e9   : > { %v664_v17 = vadd.f32 %v1026_v7, %v663_v16  ;;  %1232 = vmatprep.mubr.f32.mxu0 %v732_v13 }
 0x1ea   : > { %1233 = vmatmul.mubr.f32.vlgmr.msra.gmra.mrb[0].mxu0 %v733_v14  ;;  %v735_v20 = vmax.f32 %v669_v15, 0.0 }
 0x1eb   : > { %v734_v18 = vmax.f32 %v664_v17, 0.0  ;;  %v1184_v19 = vpop.f32.mrb[16].mxu1 }
 0x1ec   : > { %v679_v21 = vadd.f32 %v1184_v19, %v1026_v7  ;;  %v673_v22 = vpop.f32.mrb[17].mxu1 }
 0x1ed   : > { %v674_v23 = vadd.f32 %v1026_v7, %v673_v22  ;;  %1235 = vmatprep.mubr.f32.mxu0 %v734_v18 }
 0x1ee   : > { %1236 = vmatmul.mubr.f32.gmra.mrb[2].mxu0 %v735_v20  ;;  %v737_v26 = vmax.f32 %v679_v21, 0.0 }
 0x1ef   : > { %v736_v24 = vmax.f32 %v674_v23, 0.0  ;;  %v1187_v25 = vpop.f32.mrb[18].mxu1 }
 0x1f0   : > { %v689_v27 = vadd.f32 %v1187_v25, %v1026_v7  ;;  %v683_v28 = vpop.f32.mrb[19].mxu1 }
 0x1f1   : > { %v684_v29 = vadd.f32 %v1026_v7, %v683_v28  ;;  %1238 = vmatprep.mubr.f32.mxu0 %v736_v24 }
 0x1f2   : > { %1239 = vmatmul.mubr.f32.gmra.mrb[4].mxu0 %v737_v26  ;;  %v739_v32 = vmax.f32 %v689_v27, 0.0 }
 0x1f3   : > { %v738_v30 = vmax.f32 %v684_v29, 0.0  ;;  %v1190_v31 = vpop.f32.mrb[20].mxu1 }
 0x1f4   : > { %v699_v33 = vadd.f32 %v1190_v31, %v1026_v7  ;;  %v693_v34 = vpop.f32.mrb[21].mxu1 }
 0x1f5   : > { %v694_v35 = vadd.f32 %v1026_v7, %v693_v34  ;;  %1241 = vmatprep.mubr.f32.mxu0 %v738_v30 }
 0x1f6   : > { %1242 = vmatmul.mubr.f32.gmra.mrb[6].mxu0 %v739_v32  ;;  %v741_v38 = vmax.f32 %v699_v33, 0.0 }
 0x1f7   : > { %v740_v36 = vmax.f32 %v694_v35, 0.0  ;;  %v1193_v37 = vpop.f32.mrb[22].mxu1 }
 0x1f8   : > { %v709_v39 = vadd.f32 %v1193_v37, %v1026_v7  ;;  %v703_v40 = vpop.f32.mrb[23].mxu1 }
 0x1f9   : > { %v704_v41 = vadd.f32 %v1026_v7, %v703_v40  ;;  %1244 = vmatprep.mubr.f32.mxu0 %v740_v36 }
 0x1fa   : > { %1245 = vmatmul.mubr.f32.gmra.mrb[8].mxu0 %v741_v38  ;;  %v743_v45 = vmax.f32 %v709_v39, 0.0 }
 0x1fb   : > { %v742_v43 = vmax.f32 %v704_v41, 0.0  ;;  %v1196_v44 = vpop.f32.mrb[24].mxu1 }
 0x1fc   : > { %v719_v46 = vadd.f32 %v1196_v44, %v1026_v7  ;;  %v713_v47 = vpop.f32.mrb[25].mxu1 }
 0x1fd   : > { %v714_v48 = vadd.f32 %v1026_v7, %v713_v47  ;;  %1247 = vmatprep.mubr.f32.mxu0 %v742_v43 }
 0x1fe   : > { %1248 = vmatmul.mubr.f32.gmra.mrb[10].mxu0 %v743_v45  ;;  %v745_v51 = vmax.f32 %v719_v46, 0.0 }
 0x1ff   : > { %v744_v49 = vmax.f32 %v714_v48, 0.0  ;;  %v1199_v50 = vpop.f32.mrb[26].mxu1 }
 0x200   : > { %v729_v52 = vadd.f32 %v1199_v50, %v1026_v7  ;;  %v723_v53 = vpop.f32.mrb[27].mxu1 }
 0x201   : > { %v724_v54 = vadd.f32 %v1026_v7, %v723_v53  ;;  %1250 = vmatprep.mubr.f32.mxu0 %v744_v49 }
 0x202   : > { %1251 = vmatmul.mubr.f32.gmra.mrb[12].mxu0 %v745_v51  ;;  %v747_v56 = vmax.f32 %v729_v52, 0.0 }
 0x203   : > { %v746_v55 = vmax.f32 %v724_v54, 0.0 }
 0x205   : > { %1253 = vmatprep.mubr.f32.mxu0 %v746_v55 }
 0x206   : > { %1254 = vmatmul.mubr.f32.gmra.mrb[14].mxu0 %v747_v56 }
 0x2bd   : > { %v1234_v57 = vpop.f32.mrb[0].mxu0 }
 0x2be   : > { %910 = vst [vmem:[%s1676_s22 + $0x8] sm:$0xff] %v1234_v57  ;;  %v830_v42 = vpop.f32.mrb[1].mxu0 }
 0x2bf   : > { %909 = vst [vmem:[%s1676_s22] sm:$0xff] %v830_v42 }
 0x2c1   : > { %v1237_v58 = vpop.f32.mrb[2].mxu0 }
 0x2c2   : > { %912 = vst [vmem:[%s1676_s22 + $0x18] sm:$0xff] %v1237_v58  ;;  %v840_v59 = vpop.f32.mrb[3].mxu0 }
 0x2c3   : > { %911 = vst [vmem:[%s1676_s22 + $0x10] sm:$0xff] %v840_v59 }
 0x2c5   : > { %v1240_v60 = vpop.f32.mrb[4].mxu0 }
 0x2c6   : > { %914 = vst [vmem:[%s1676_s22 + $0x28] sm:$0xff] %v1240_v60  ;;  %v850_v61 = vpop.f32.mrb[5].mxu0 }
 0x2c7   : > { %913 = vst [vmem:[%s1676_s22 + $0x20] sm:$0xff] %v850_v61 }
 0x2c9   : > { %v1243_v62 = vpop.f32.mrb[6].mxu0 }
 0x2ca   : > { %916 = vst [vmem:[%s1676_s22 + $0x38] sm:$0xff] %v1243_v62  ;;  %v860_v63 = vpop.f32.mrb[7].mxu0 }
 0x2cb   : > { %915 = vst [vmem:[%s1676_s22 + $0x30] sm:$0xff] %v860_v63 }
 0x2cd   : > { %v1246_v0 = vpop.f32.mrb[8].mxu0 }
 0x2ce   : > { %918 = vst [vmem:[%s1676_s22 + $0x48] sm:$0xff] %v1246_v0  ;;  %v870_v1 = vpop.f32.mrb[9].mxu0 }
 0x2cf   : > { %917 = vst [vmem:[%s1676_s22 + $0x40] sm:$0xff] %v870_v1 }
 0x2d1   : > { %v1249_v2 = vpop.f32.mrb[10].mxu0 }
 0x2d2   : > { %920 = vst [vmem:[%s1676_s22 + $0x58] sm:$0xff] %v1249_v2  ;;  %v880_v3 = vpop.f32.mrb[11].mxu0 }
 0x2d3   : > { %919 = vst [vmem:[%s1676_s22 + $0x50] sm:$0xff] %v880_v3 }
 0x2d5   : > { %v1252_v4 = vpop.f32.mrb[12].mxu0  ;;  %932 = sbr.rel (!%p1499_p5) target bundleno = 760 (0x2f8), region = 44 }
 0x2d6   : > { %922 = vst [vmem:[%s1676_s22 + $0x68] sm:$0xff] %v1252_v4  ;;  %v890_v5 = vpop.f32.mrb[13].mxu0 }
 0x2d7   : > { %921 = vst [vmem:[%s1676_s22 + $0x60] sm:$0xff] %v890_v5 }
 0x2d9   : > { %v1255_v6 = vpop.f32.mrb[14].mxu0 }
 0x2da   : > { %924 = vst [vmem:[%s1676_s22 + $0x78] sm:$0xff] %v1255_v6  ;;  %v900_v7 = vpop.f32.mrb[15].mxu0 }
 0x2db   : > { %923 = vst [vmem:[%s1676_s22 + $0x70] sm:$0xff] %v900_v7 }
 0x2dc   : > { %s1771_s30 = smov (!%p935_p11, %s934_s30), 16 }
 0x2dd   : > { %s1701_s10 = sshll.u32 %s1771_s30, 7 }
 0x2de   : > { %s939_s11 = ssub.s32 2048, %s1701_s10 }
 0x2df   : > { %940 = vsyncadd %s1696_s27, %s939_s11  ;;  %p1046_p12 = scmp.ne.s32.totalorder %s1701_s10, 0  ;;  %s1052_s12 = sshll.u32 %s1482_s0, 11 }
 0x2e0   : > { %s1710_s15 = scalar_lea.hbm %s1763_s6, %s1052_s12  ;;  %s945_s29 = sshll.u32 %s1676_s22, 4  ;;  %s1713_s29 = int_to_ptr.vmem [resolvable:$true] %s945_s29 }
 0x2e1   : > { %s1356_s16 = scalar_lea.vmem %s1713_s29, %s1701_s10  ;;  %s1420_s17 = smov [#allocation4]  }
 0x2e2   : > { %p1357_p13 = scmp.ne.s32.totalorder %s1713_s29, %s1356_s16  ;;  %s1360_s18 = sshll.u32 %s1420_s17, 4  ;;  %s1361_s18 = int_to_ptr.vmem [resolvable:$false] %s1360_s18 }
 0x2e3   : > { %s1362_s0 = scalar_lea.vmem %s1361_s18, 4096  ;;  %p1363_p2 = scmp.lt.s32.totalorder %s1713_s29, %s1361_s18 }
 0x2e4   : > { %p1358_p0 = pnand %p1357_p13, %p1046_p12  ;;  %p1364_p3 = scmp.lt.s32.totalorder %s1362_s0, %s1356_s16 }
 0x2e6   : > { %p1359_p1 = pneg %p1358_p0  ;;  %p1365_p4 = por %p1364_p3, %p1363_p2 }
 0x2e8   : > { %p1366_p5 = pnand %p1365_p4, %p1359_p1 }
 0x2ea   : > { %1369 = shalt.err (!%p1366_p5)
}
 0x2eb   : > { %s1370_s19 = scalar_lea.hbm %s1710_s15, %s1701_s10  ;;  %s1374_s21 = scalar_lea.hbm %s1763_s6, 3200 }
 0x2ec   : > { %p1371_p7 = scmp.ne.s32.totalorder %s1710_s15, %s1370_s19  ;;  %p1375_p10 = scmp.lt.u32.totalorder %s1710_s15, %s1763_s6 }
 0x2ed   : > { %p1376_p11 = scmp.lt.u32.totalorder %s1374_s21, %s1370_s19  ;;  %p1378_p0 = scmp.lt.u32.totalorder %s1370_s19, %s1710_s15 }
 0x2ee   : > { %p1372_p8 = pnand %p1371_p7, %p1046_p12 }
 0x2ef   : > { %p1377_p13 = por %p1376_p11, %p1375_p10 }
 0x2f0   : > { %p1373_p9 = pneg %p1372_p8 }
 0x2f1   : > { %p1379_p1 = por %p1378_p0, %p1377_p13 }
 0x2f3   : > { %p1380_p2 = pnand %p1379_p1, %p1373_p9 }
 0x2f5   : > { %1383 = shalt.err (!%p1380_p2)
}
 0x2f6   : > { %s1421_s11 = smov 128   ;;  %s1422_s12 = smov 8  }
 0x2f7   : > { %951 = dma.vmem_to_hbm [thread:$0]  (%p1046_p12), %s1713_s29, %s1701_s10, %s1710_s15, %s1696_s27, %s1421_s11, %s1421_s11, %s1422_s12  }
 0x2f8 PF: > { %p1321_p3 = scmp.ge.s32.totalorder %s1418_s26, 2  ;;  %s960_s14 = sand.u32 1, %s1406_s23  }
 0x2f9   : > { %s961_s8 = scalar_lea.sflag [#allocation5], %s960_s14 }
 0x2fa   : > { %p1318_p4 = pnand %p1321_p3, %p1503_p6 }
 0x2fc   : > { %1401 = dma.done.wait (!%p1318_p4), %s961_s8, 2048  }
 0x2fd   : > { %1403 = vsyncadd (!%p1318_p4), %s961_s8, 4294965248  ;;  %p17_p5 = scmp.ge.s32.totalorder %s1486_s28, 4   ;;  %s1766_s23 = smov %s1410_s24 }
 0x2fe   : > { %s1767_s24 = smov %s1414_s25  ;;  %s1768_s25 = smov %s1497_s7 }
 0x2ff   : > { %s1769_s26 = smov %s1486_s28  ;;  %19 = sbr.rel (!%p17_p5) target bundleno = 5 (0x5), region = 75 }
 0x306   :  { %966 = vsyncpa [#allocation5], 1 }
 0x307   :  { %968 = vsyncpa [#allocation5 + $0x1], 1 }

</bundles_post_ra>
